<compile_context>
chip_gen: v6e
topology: v6e:2x2x1
jax: 0.10.0
libtpu: 0.0.40
codegen_flags: <defaults>
</compile_context>

<pallas_src>
import copy

import jax
import jax.numpy as jnp
from jax.experimental import pallas as pl
from jax.experimental.pallas import tpu as pltpu


_LANE = 128
_SUBLANE = 8


def _round_up(x, m):
    return ((x + m - 1) // m) * m


def _vmem_plan():
    """Generation-aware (vmem_limit_bytes, tile_budget_bytes)."""
    try:
        cap = int(pltpu.get_tpu_info().vmem_capacity_bytes)
    except Exception:
        cap = 64 << 20  # conservative: v7x per-core VMEM
    vmem_limit = int(cap * 0.70)   # explicit scoped-VMEM limit we request
    tile_budget = vmem_limit // 2  # headroom for pipeline/compiler scratch
    return vmem_limit, tile_budget


def _select_weight_tiles(in_features, out_features, in_itemsize, tile_budget):
    """Pick (tn, tk, INp, OUTp) independent of the batch size so the padded,
    transposed weight can be cached at module construction."""
    tn = min(512, _round_up(out_features, _LANE))
    OUTp = _round_up(out_features, tn)
    in128 = _round_up(in_features, _LANE)
    w_budget = tile_budget // 2            # weight stream gets ~half the budget
    k_steps = 1
    while True:
        tk = _round_up(-(-in128 // k_steps), _LANE)
        if 2 * tk * tn * in_itemsize <= w_budget or tk == _LANE:
            break
        k_steps *= 2
    INp = tk * (-(-in128 // tk))           # multiple of tk, >= in_features
    return tn, tk, INp, OUTp


def _select_tm(batch, tn, tk, in_itemsize, out_itemsize, tile_budget, j_grid):
    """Batch tile: as large as the remaining VMEM budget allows."""
    tm = min(512, _round_up(batch, _SUBLANE))

    def footprint(m):
        return (2 * (m * tk + tk * tn) * in_itemsize    # x + W, double-buffered
                + 2 * m * tn * out_itemsize             # output, double-buffered
                + m * tn * 4)                           # f32 accumulator

    while footprint(tm) > tile_budget and tm > _SUBLANE:
        tm = max(_SUBLANE, _round_up(tm // 2, _SUBLANE))

    # v7x megacore: if the OUT axis has a single tile, make sure the batch axis
    # has >= 2 tiles so both TensorCores get work (only worth it for big tm).
    if j_grid == 1 and _round_up(batch, tm) // tm < 2 and tm >= 256:
        tm = _round_up(tm // 2, _SUBLANE)
    return tm


# ----------------------------------------------------------------------------
# Pallas kernel: tiled Linear forward  y = x @ W^T + b  (W passed pre-transposed)
# ----------------------------------------------------------------------------
def _linear_kernel(x_ref, wt_ref, b_ref, o_ref, acc_ref):
    # x_ref: (tm, tk)  wt_ref: (tk, tn)  b_ref: (1, tn) f32  o_ref: (tm, tn)
    # acc_ref: (tm, tn) f32 scratch, resident across the K grid axis.
    k = pl.program_id(2)

    @pl.when(k == 0)
    def _():
        acc_ref[...] = jnp.zeros_like(acc_ref)

    # Canonical (tm,tk) x (tk,tn) contraction: MXU-direct, f32 accumulation.
    acc_ref[...] += jnp.dot(x_ref[...], wt_ref[...],
                            preferred_element_type=jnp.float32)

    @pl.when(k == pl.num_programs(2) - 1)
    def _():
        o_ref[...] = (acc_ref[...] + b_ref[...]).astype(o_ref.dtype)


def pallas_linear(x2d, w_t_padded, bias_padded, *, tn, tk, out_features,
                  compute_dtype, out_dtype, vmem_limit, tile_budget):
    """y = x @ W^T + b with W cached pre-padded/transposed as (INp, OUTp)."""
    B, in_features = x2d.shape
    INp, OUTp = w_t_padded.shape
    j_grid = OUTp // tn

    in_itemsize = jnp.dtype(compute_dtype).itemsize
    out_itemsize = jnp.dtype(out_dtype).itemsize
    tm = _select_tm(B, tn, tk, in_itemsize, out_itemsize, tile_budget, j_grid)
    Bp = _round_up(B, tm)

    x_p = x2d.astype(compute_dtype)
    if Bp != B or INp != in_features:
        x_p = jnp.pad(x_p, ((0, Bp - B), (0, INp - in_features)))

    grid = (Bp // tm, OUTp // tn, INp // tk)

    out = pl.pallas_call(
        _linear_kernel,
        out_shape=jax.ShapeDtypeStruct((Bp, OUTp), out_dtype),
        grid_spec=pltpu.PrefetchScalarGridSpec(
            num_scalar_prefetch=0,
            grid=grid,
            in_specs=[
                pl.BlockSpec((tm, tk), lambda i, j, k: (i, k)),   # x tile
                pl.BlockSpec((tk, tn), lambda i, j, k: (k, j)),   # W^T tile
                pl.BlockSpec((1, tn), lambda i, j, k: (0, j)),    # bias tile
            ],
            out_specs=pl.BlockSpec((tm, tn), lambda i, j, k: (i, j)),
            scratch_shapes=[pltpu.VMEM((tm, tn), jnp.float32)],
        ),
        compiler_params=pltpu.CompilerParams(
            dimension_semantics=("parallel", "parallel", "arbitrary"),
            vmem_limit_bytes=vmem_limit),
    )(x_p, w_t_padded, bias_padded)

    if Bp != B or OUTp != out_features:
        out = out[:B, :out_features]
    return out


# ----------------------------------------------------------------------------
# Wrapped Linear module (params + Pallas forward)
# ----------------------------------------------------------------------------
class LinearModule:
    """Stand-in for the wrapped torch.nn.Linear: holds params; forward runs the
    Pallas kernel.  Weight is padded/transposed/cast once at construction."""

    def __init__(self, weight, bias, compute_dtype=jnp.bfloat16):
        self.weight = weight                # (out_features, in_features)
        self.bias = bias                    # (out_features,)
        self.compute_dtype = compute_dtype
        self.out_features, self.in_features = weight.shape

        self.vmem_limit, self.tile_budget = _vmem_plan()
        self.tn, self.tk, self.INp, self.OUTp = _select_weight_tiles(
            self.in_features, self.out_features,
            jnp.dtype(compute_dtype).itemsize, self.tile_budget)

        # Cached, pre-padded, pre-transposed, pre-cast weight: (INp, OUTp).
        wt = weight.T.astype(compute_dtype)
        self.w_t_padded = jnp.pad(
            wt, ((0, self.INp - self.in_features),
                 (0, self.OUTp - self.out_features)))
        self.bias_padded = jnp.pad(
            bias.astype(jnp.float32),
            (0, self.OUTp - self.out_features)).reshape(1, self.OUTp)

    def __call__(self, x):
        # Support arbitrary leading dims like torch.nn.Linear.
        lead = x.shape[:-1]
        x2d = x.reshape(-1, x.shape[-1])
        y = pallas_linear(
            x2d, self.w_t_padded, self.bias_padded,
            tn=self.tn, tk=self.tk, out_features=self.out_features,
            compute_dtype=self.compute_dtype, out_dtype=x.dtype,
            vmem_limit=self.vmem_limit, tile_budget=self.tile_budget)
        return y.reshape(*lead, self.out_features)


# ----------------------------------------------------------------------------
# ModulesToSaveWrapper re-implementation (dispatch glue in plain Python)
# ----------------------------------------------------------------------------
class ModulesToSaveWrapper:
    def __init__(self, module_to_save, adapter_name):
        self.original_module = module_to_save
        self.modules_to_save = {}
        self.update(adapter_name)
        self.active_adapter = adapter_name

    def update(self, adapter_name):
        # As in PyTorch: deep-copy of the original module (value-equal params).
        self.modules_to_save[adapter_name] = copy.deepcopy(self.original_module)

    def forward(self, *args, **kwargs):
        if self.active_adapter not in self.modules_to_save:
            return self.original_module(*args, **kwargs)
        return self.modules_to_save[self.active_adapter](*args, **kwargs)

    __call__ = forward


# ----------------------------------------------------------------------------
# Demo
# ----------------------------------------------------------------------------
if __name__ == "__main__":
    key = jax.random.PRNGKey(0)
    k_x, k_w, k_b = jax.random.split(key, 3)

    batch, in_features, out_features = 8, 32, 16

    x = jax.random.normal(k_x, (batch, in_features), dtype=jnp.float32)
    bound = 1.0 / jnp.sqrt(in_features)
    weight = jax.random.uniform(
        k_w, (out_features, in_features), minval=-bound, maxval=bound,
        dtype=jnp.float32)
    bias = jax.random.uniform(
        k_b, (out_features,), minval=-bound, maxval=bound, dtype=jnp.float32)

    original = LinearModule(weight, bias)
    wrapper = ModulesToSaveWrapper(original, adapter_name="default")

    # Active adapter registered -> dispatches to modules_to_save["default"].
    y = jax.block_until_ready(wrapper(x))

    # Fallback path (adapter not registered) -> original module.
    wrapper.active_adapter = "missing"
    y_fallback = jax.block_until_ready(wrapper(x))

    # Reference in matching precision (bf16 operands, f32 accumulation).
    y_ref_bf16 = jnp.dot(x.astype(jnp.bfloat16),
                         weight.astype(jnp.bfloat16).T,
                         preferred_element_type=jnp.float32) + bias
    # Pure f32 reference (loose check: bf16 MXU operands).
    y_ref_f32 = x @ weight.T + bias

    assert jnp.allclose(y, y_ref_bf16, atol=1e-3, rtol=1e-3)
    assert jnp.allclose(y_fallback, y_ref_bf16, atol=1e-3, rtol=1e-3)
    assert jnp.allclose(y, y_ref_f32, atol=5e-2, rtol=5e-2)

    print("KERNEL_OK")
</pallas_src>

<mosaic_0001>
module attributes {stable_mosaic.version = 11 : i64} {
  func.func @_linear_kernel(%arg0: i32, %arg1: i32, %arg2: i32, %arg3: memref<8x128xbf16, #tpu.memory_space<vmem>>, %arg4: memref<128x128xbf16, #tpu.memory_space<vmem>>, %arg5: memref<1x128xf32, #tpu.memory_space<vmem>>, %arg6: memref<8x128xf32, #tpu.memory_space<vmem>>, %arg7: memref<8x128xf32, #tpu.memory_space<vmem>>) attributes {dimension_semantics = [#tpu.dimension_semantics<parallel>, #tpu.dimension_semantics<parallel>, #tpu.dimension_semantics<arbitrary>], iteration_bounds = array<i64: 1, 1, 1>, scalar_prefetch = 0 : i64, scratch_operands = 1 : i64, tpu.core_type = #tpu.core_type<tc>, window_params = [{transform_indices = @transform_0, window_bounds = array<i64: 8, 128>}, {transform_indices = @transform_1, window_bounds = array<i64: 128, 128>}, {transform_indices = @transform_2, window_bounds = array<i64: 1, 128>}, {transform_indices = @transform_3, window_bounds = array<i64: 8, 128>}]} {
    %c0_i32 = arith.constant 0 : i32
    %0 = arith.cmpi eq, %arg2, %c0_i32 : i32
    %1 = arith.extui %0 : i1 to i32
    %c0_i32_0 = arith.constant 0 : i32
    %2 = arith.cmpi ne, %1, %c0_i32_0 : i32
    scf.if %2 {
      %cst_10 = arith.constant 0.000000e+00 : f32
      %12 = vector.broadcast %cst_10 : f32 to vector<8x128xf32>
      %c0_11 = arith.constant 0 : index
      %c0_12 = arith.constant 0 : index
      %13 = vector.load %arg7[%c0_11, %c0_12] : memref<8x128xf32, #tpu.memory_space<vmem>>, vector<8x128xf32>
      tpu.vector_store %arg7[%c0_11, %c0_12], %12 {strides = array<i32>} : memref<8x128xf32, #tpu.memory_space<vmem>>, vector<8x128xf32>,
    } else {
    }
    %c0 = arith.constant 0 : index
    %c0_1 = arith.constant 0 : index
    %3 = vector.load %arg7[%c0, %c0_1] : memref<8x128xf32, #tpu.memory_space<vmem>>, vector<8x128xf32>
    %c0_2 = arith.constant 0 : index
    %c0_3 = arith.constant 0 : index
    %4 = vector.load %arg3[%c0_2, %c0_3] : memref<8x128xbf16, #tpu.memory_space<vmem>>, vector<8x128xbf16>
    %c0_4 = arith.constant 0 : index
    %c0_5 = arith.constant 0 : index
    %5 = vector.load %arg4[%c0_4, %c0_5] : memref<128x128xbf16, #tpu.memory_space<vmem>>, vector<128x128xbf16>
    %cst = arith.constant dense<0.000000e+00> : vector<8x128xf32>
    %6 = tpu.matmul %4, %5, %cst {dimension_numbers = #tpu.dot_dimension_numbers<[1], [0], [0], [1], [0, 0, 1, 1], [], []>} : vector<8x128xbf16>, vector<128x128xbf16>, vector<8x128xf32> -> vector<8x128xf32>
    %7 = arith.addf %3, %6 : vector<8x128xf32>
    %c0_6 = arith.constant 0 : index
    %c0_7 = arith.constant 0 : index
    %8 = vector.load %arg7[%c0_6, %c0_7] : memref<8x128xf32, #tpu.memory_space<vmem>>, vector<8x128xf32>
    tpu.vector_store %arg7[%c0_6, %c0_7], %7 {strides = array<i32>} : memref<8x128xf32, #tpu.memory_space<vmem>>, vector<8x128xf32>,
    %c0_i32_8 = arith.constant 0 : i32
    %9 = arith.cmpi eq, %arg2, %c0_i32_8 : i32
    %10 = arith.extui %9 : i1 to i32
    %c0_i32_9 = arith.constant 0 : i32
    %11 = arith.cmpi ne, %10, %c0_i32_9 : i32
    scf.if %11 {
      %c0_10 = arith.constant 0 : index
      %c0_11 = arith.constant 0 : index
      %12 = vector.load %arg7[%c0_10, %c0_11] : memref<8x128xf32, #tpu.memory_space<vmem>>, vector<8x128xf32>
      %c0_12 = arith.constant 0 : index
      %c0_13 = arith.constant 0 : index
      %13 = vector.load %arg5[%c0_12, %c0_13] : memref<1x128xf32, #tpu.memory_space<vmem>>, vector<1x128xf32>
      %14 = vector.broadcast %13 : vector<1x128xf32> to vector<8x128xf32>
      %15 = arith.addf %12, %14 : vector<8x128xf32>
      %c0_14 = arith.constant 0 : index
      %c0_15 = arith.constant 0 : index
      %16 = vector.load %arg6[%c0_14, %c0_15] : memref<8x128xf32, #tpu.memory_space<vmem>>, vector<8x128xf32>
      tpu.vector_store %arg6[%c0_14, %c0_15], %15 {strides = array<i32>} : memref<8x128xf32, #tpu.memory_space<vmem>>, vector<8x128xf32>,
    } else {
    }
    return
  }
  func.func @transform_0(%arg0: i32, %arg1: i32, %arg2: i32) -> (i32, i32) {
    %c0_i32 = arith.constant 0 : i32
    return %arg0, %arg2 : i32, i32
  }
  func.func @transform_1(%arg0: i32, %arg1: i32, %arg2: i32) -> (i32, i32) {
    %c0_i32 = arith.constant 0 : i32
    return %arg2, %arg1 : i32, i32
  }
  func.func @transform_2(%arg0: i32, %arg1: i32, %arg2: i32) -> (i32, i32) {
    %c0_i32 = arith.constant 0 : i32
    %c0_i32_0 = arith.constant 0 : i32
    return %c0_i32, %arg1 : i32, i32
  }
  func.func @transform_3(%arg0: i32, %arg1: i32, %arg2: i32) -> (i32, i32) {
    %c0_i32 = arith.constant 0 : i32
    return %arg0, %arg1 : i32, i32
  }
}

</mosaic_0001>

<bundles_post_ra>
// kernel: tpu_custom_call.1
= control target key start
LH: loop header
LB: loop body
LE: loop exit
PB: predicated region body
PF: predicated region fallthrough
CT: control target
= control target key end

     0   :  { %8 = vsyncpa [#allocation4], 0  ;;  %s342_s0 = inlined_call_operand.hbm [shape: bf16[8,128], index: 0, kind: input, shape index: {}]   ;;  %s343_s1 = inlined_call_operand.hbm [shape: bf16[128,128], index: 1, kind: input, shape index: {}]   ;;  %s344_s2 = inlined_call_operand.vmem [shape: f32[1,128], index: 2, kind: input, shape index: {}]   ;;  %s345_s3 = inlined_call_operand.hbm [shape: f32[8,128], index: 3, kind: output, shape index: {}]  }
   0x1   :  { %9 = vsyncpa [#allocation7], 0 }
   0x2   :  { %10 = vsyncpa [#allocation5], 0  ;;  %s303_s12 = smov [#allocation3]   ;;  %s304_s14 = smov [#allocation6]  }
   0x3   :  { %s17_s13 = sshll.u32 %s303_s12, 4  ;;  %s26_s15 = sshll.u32 %s304_s14, 4  ;;  %s18_s13 = int_to_ptr.vmem [resolvable:$true] %s17_s13  ;;  %s27_s15 = int_to_ptr.vmem [resolvable:$true] %s26_s15 }
   0x4   :  { %s245_s16 = scalar_lea.vmem %s18_s13, 64  ;;  %p250_p1 = scmp.lt.s32.totalorder %s18_s13, %s18_s13 }
   0x5   :  { %p246_p0 = scmp.ne.s32.totalorder %s18_s13, %s245_s16  ;;  %p251_p2 = scmp.lt.s32.totalorder %s245_s16, %s245_s16 }
   0x7   :  { %p252_p3 = por %p251_p2, %p250_p1 }
   0x9   :  { %p253_p4 = pnand %p252_p3, %p246_p0 }
   0xb   :  { %256 = shalt.err (!%p253_p4)
}
   0xc   :  { %20 = dma.hbm_to_vmem [thread:$0]  %s342_s0, 64, %s18_s13, [#allocation4]  }
   0xd   :  { %s265_s19 = scalar_lea.vmem %s27_s15, 1024  ;;  %p270_p6 = scmp.lt.s32.totalorder %s27_s15, %s27_s15 }
   0xe   :  { %p266_p5 = scmp.ne.s32.totalorder %s27_s15, %s265_s19  ;;  %p271_p7 = scmp.lt.s32.totalorder %s265_s19, %s265_s19 }
  0x10   :  { %p272_p8 = por %p271_p7, %p270_p6 }
  0x12   :  { %p273_p9 = pnand %p272_p8, %p266_p5 }
  0x14   :  { %276 = shalt.err (!%p273_p9)
}
  0x15   :  { %s305_s20 = smov 64   ;;  %s306_s21 = smov 4  }
  0x16   :  { %32 = dma.hbm_to_vmem [thread:$0]  %s343_s1, 1024, %s27_s15, [#allocation7], %s305_s20, %s305_s20, %s306_s21  }
  0x17   :  { %297 = dma.done.wait [#allocation4], 64  }
  0x18   :  { %298 = vsyncadd [#allocation4], 4294967232 }
  0x19   :  { %299 = dma.done.wait [#allocation7], 1024  }
  0x1a   :  { %300 = vsyncadd [#allocation7], 4294966272  ;;  %v307_v0 = vmov 0.0   ;;  %vm308_vm0 = vmmov 0   ;;  %v229_v1 = vld [vmem:[#allocation6 + $0x38] sm:$0xff]   ;;  %v230_v2 = vld [vmem:[#allocation6 + $0x30] sm:$0xff]  }
  0x1b   :  { %202 = vmatprep.subr.bf16.mxu0 %v307_v0  ;;  %218 = vmatprep.mubr.msk.bf16.mxu0 %vm308_vm0, %v307_v0  ;;  %v231_v3 = vld [vmem:[#allocation6 + $0x28] sm:$0xff]   ;;  %v232_v4 = vld [vmem:[#allocation6 + $0x20] sm:$0xff]   ;;  %v233_v5 = vld [vmem:[#allocation6 + $0x18] sm:$0xff]   ;;  %s309_s24 = smov [#allocation8]  }
  0x1c   :  { %203 = vmatpush3.bf16.msra.mxu0 %v229_v1  ;;  %v234_v6 = vld [vmem:[#allocation6 + $0x10] sm:$0xff]   ;;  %v235_v7 = vld [vmem:[#allocation6 + $0x8] sm:$0xff]   ;;  %v236_v8 = vld [vmem:[#allocation6] sm:$0xff]   ;;  %s174_s25 = sshll.u32 %s309_s24, 4  ;;  %s175_s25 = int_to_ptr.vmem [resolvable:$true] %s174_s25 }
  0x1d   :  { %204 = vmatprep.subr.bf16.mxu0 %v307_v0  ;;  %v48_v9 = vld [vmem:[#allocation3] sm:$0xf]  ;;  %s277_s26 = scalar_lea.vmem %s175_s25, 128  ;;  %p282_p11 = scmp.lt.s32.totalorder %s175_s25, %s175_s25 }
  0x1e   :  { %v192_v10 = vld [vmem:[%s344_s2] ss:$0 sm:$0xff]  ;;  %p278_p10 = scmp.ne.s32.totalorder %s175_s25, %s277_s26  ;;  %p283_p12 = scmp.lt.s32.totalorder %s277_s26, %s277_s26 }
  0x20   :  { %205 = vmatpush3.bf16.msra.mxu0 %v230_v2  ;;  %p284_p13 = por %p283_p12, %p282_p11 }
  0x21   :  { %206 = vmatprep.subr.bf16.mxu0 %v307_v0 }
  0x22   :  { %p285_p0 = pnand %p284_p13, %p278_p10 }
  0x24   :  { %207 = vmatpush3.bf16.msra.mxu0 %v231_v3 }
  0x25   :  { %208 = vmatprep.subr.bf16.mxu0 %v307_v0 }
  0x28   :  { %209 = vmatpush3.bf16.msra.mxu0 %v232_v4 }
  0x29   :  { %210 = vmatprep.subr.bf16.mxu0 %v307_v0 }
  0x2c   :  { %211 = vmatpush3.bf16.msra.mxu0 %v233_v5 }
  0x2d   :  { %212 = vmatprep.subr.bf16.mxu0 %v307_v0 }
  0x30   :  { %213 = vmatpush3.bf16.msra.mxu0 %v234_v6 }
  0x31   :  { %214 = vmatprep.subr.bf16.mxu0 %v307_v0 }
  0x34   :  { %215 = vmatpush3.bf16.msra.mxu0 %v235_v7 }
  0x35   :  { %216 = vmatprep.subr.bf16.mxu0 %v307_v0 }
  0x38   :  { %217 = vmatpush3.bf16.msra.mxu0 %v236_v8 }
  0x3b   :  { %219 = vmatmul.mubr.bf16.vlgmr.msra.gmra.mxu0 %v48_v9 }
  0xfb   :  { %v147_v11 = vpop.f32.mrf.mxu0 }
  0xfc   :  { %v166_v12 = vadd.f32 %v192_v10, %v147_v11 }
  0xfd   :  { %v220_v13 = vpop.f32.mrf.mxu0 }
  0xfe   :  { %167 = vst [vmem:[#allocation8] sm:$0xff] %v166_v12 }
  0xff   :  { %v150_v14 = vpop.f32.mrf.mxu0 }
 0x100   :  { %288 = shalt.err (!%p285_p0)
}
 0x101   :  { %177 = dma.vmem_to_hbm [thread:$0]  %s175_s25, 128, %s345_s3, [#allocation5]   ;;  %v221_v15 = vpop.f32.mrf.mxu0 }
 0x102   :  { %301 = dma.done.wait [#allocation5], 128  }
 0x103   :  { %302 = vsyncadd [#allocation5], 4294967168 }
 0x104   :  { %181 = vsyncpa [#allocation4], 1 }
 0x105   :  { %182 = vsyncpa [#allocation7], 1 }
 0x106   :  { %183 = vsyncpa [#allocation5], 1 }

</bundles_post_ra>
